<compile_context>
chip_gen: v5e
topology: v5e:2x2
jax: 0.10.0
libtpu: 0.0.40
codegen_flags: <defaults>
</compile_context>

<pallas_src>
import functools

import jax
import jax.numpy as jnp
import numpy as np
from jax.experimental import pallas as pl
from jax.experimental.pallas import tpu as pltpu

_LANE = 128


def _round_up(v, m):
    return (v + m - 1) // m * m


def _fr_kernel(x_ref, w_ref, shift_ref, o_ref):
    """Fused block-diagonal 1x1-conv matmul + BN shift add.

    x_ref:     (K_all, t_lane)  compute dtype, branch-concatenated relu'd input
    w_ref:     (C_out, K_all)   compute dtype, block-diagonal, BN scale folded
    shift_ref: (C_out, 1)       f32 BN shift
    o_ref:     (C_out, t_lane)  output dtype (lane-dense store)
    """
    y = jnp.dot(w_ref[...], x_ref[...], preferred_element_type=jnp.float32)
    o_ref[...] = (y + shift_ref[...]).astype(o_ref.dtype)


def _vmem_budget():
    """Generation-aware activation-block budget and scoped VMEM limit."""
    try:
        cap = int(pltpu.get_tpu_info().vmem_capacity_bytes)
    except Exception:
        cap = 64 * 1024 * 1024          # conservative (v7x-sized) fallback
    budget = min(cap // 3, 48 * 1024 * 1024)
    vmem_limit = min(cap * 3 // 4, 100 * 1024 * 1024)
    return budget, int(vmem_limit)


@functools.partial(
    jax.jit, static_argnames=("stride", "eps", "compute_dtype", "out_dtype"))
def factorized_reduce(x, conv_weights, bn_gamma, bn_beta, bn_mean, bn_var,
                      *, stride, eps=1e-5, compute_dtype=jnp.bfloat16,
                      out_dtype=None):
    """x: (N, C_in, H, W) NCHW (like PyTorch). Returns (N, C_out, Ho, Wo)."""
    N, C_in, H, W = x.shape
    assert stride == len(conv_weights)
    Ho = (H - 1) // stride + 1
    Wo = (W - 1) // stride + 1
    L = Ho * Wo
    C_out = sum(int(w.shape[0]) for w in conv_weights)
    K_all = stride * C_in
    if out_dtype is None:
        out_dtype = compute_dtype

    # ---- lane tiling (budget includes double-buffered weight/shift) -------
    budget, vmem_limit = _vmem_budget()
    cdt_size = jnp.dtype(compute_dtype).itemsize
    odt_size = jnp.dtype(out_dtype).itemsize
    fixed_bytes = 2 * (C_out * K_all * cdt_size + C_out * 4)       # W + shift
    bytes_per_lane = 2 * (K_all * cdt_size + C_out * odt_size)     # x + out
    max_lanes = max(_LANE, (budget - fixed_bytes) // bytes_per_lane)

    if L <= max_lanes:
        # Common NAS case: the whole flattened spatial extent is one block
        # (block dim == full array dim is always legal) -> no lane padding,
        # no post-call slice, no wasted DMA bytes.
        t_lane, L_pad = L, L
    else:
        cap = max(_LANE, (max_lanes // _LANE) * _LANE)
        t_lane = None
        for cand in range(cap, _LANE - 1, -_LANE):     # prefer a divisor of L
            if L % cand == 0:
                t_lane = cand
                break
        if t_lane is None:
            t_lane = cap
        L_pad = _round_up(L, t_lane)

    n_lane_tiles = L_pad // t_lane
    # v7x dual TensorCore: keep >= 2 balanced "parallel" grid points.
    if N * n_lane_tiles < 2 and L % (2 * _LANE) == 0:
        t_lane = L // 2
        L_pad = L
        n_lane_tiles = 2

    # ---- wrapper-side prep: ONE fused pass under jit -----------------------
    # f32 ReLU (v5e VPU has no bf16 max), right/bottom zero-pad, per-branch
    # strided sampling, channel-concat, cast to compute dtype.
    xr = jnp.maximum(x, 0.0)
    pad_h = Ho * stride - H
    pad_w = Wo * stride - W
    if pad_h or pad_w:
        xr = jnp.pad(xr, ((0, 0), (0, 0), (0, pad_h), (0, pad_w)))
    branches = [xr[:, :, k::stride, k::stride].reshape(N, C_in, L)
                for k in range(stride)]
    x_all = jnp.concatenate(branches, axis=1).astype(compute_dtype)  # (N,K_all,L)
    if L_pad != L:
        # TODO(synk): rare fallback (very large feature maps); costs one extra
        # pad pass on x_all and one slice pass on the output.
        x_all = jnp.pad(x_all, ((0, 0), (0, 0), (0, L_pad - L)))

    # ---- fold eval-mode BatchNorm: scale -> weights, keep shift only -------
    scale = bn_gamma / jnp.sqrt(bn_var + eps)
    shift = (bn_beta - bn_mean * scale).astype(jnp.float32).reshape(C_out, 1)

    w_bd = jnp.zeros((C_out, K_all), jnp.float32)          # block-diagonal
    off = 0
    for k, w in enumerate(conv_weights):
        cb = int(w.shape[0])
        w_bd = w_bd.at[off:off + cb, k * C_in:(k + 1) * C_in].set(
            w.reshape(cb, C_in).astype(jnp.float32))
        off += cb
    w_bd = (w_bd * scale[:, None]).astype(compute_dtype)

    grid = (N, n_lane_tiles)
    out = pl.pallas_call(
        _fr_kernel,
        out_shape=jax.ShapeDtypeStruct((N, C_out, L_pad), out_dtype),
        grid_spec=pltpu.PrefetchScalarGridSpec(
            num_scalar_prefetch=0,
            grid=grid,
            in_specs=[
                pl.BlockSpec((None, K_all, t_lane), lambda n, j: (n, 0, j)),
                pl.BlockSpec((C_out, K_all), lambda n, j: (0, 0)),
                pl.BlockSpec((C_out, 1), lambda n, j: (0, 0)),
            ],
            out_specs=pl.BlockSpec((None, C_out, t_lane),
                                   lambda n, j: (n, 0, j)),
        ),
        compiler_params=pltpu.CompilerParams(
            dimension_semantics=("parallel", "parallel"),
            vmem_limit_bytes=vmem_limit),
    )(x_all, w_bd, shift)

    if L_pad != L:
        out = out[:, :, :L]
    return out.reshape(N, C_out, Ho, Wo)


def _reference(x, conv_weights, gamma, beta, mean, var, stride, eps=1e-5):
    """Pure-JAX f32 reference mirroring the PyTorch forward (eval-mode BN)."""
    N, C_in, H, W = x.shape
    Ho = (H - 1) // stride + 1
    Wo = (W - 1) // stride + 1
    xr = jnp.maximum(x, 0.0)
    xp = jnp.pad(xr, ((0, 0), (0, 0), (0, stride - 1), (0, stride - 1)))
    outs = []
    for k, w in enumerate(conv_weights):
        xs = xp[:, :, k::stride, k::stride][:, :, :Ho, :Wo]
        w2 = w.reshape(w.shape[0], C_in)
        outs.append(jnp.einsum('nchw,oc->nohw', xs, w2))
    y = jnp.concatenate(outs, axis=1)
    scale = gamma / jnp.sqrt(var + eps)
    shift = beta - mean * scale
    return y * scale[None, :, None, None] + shift[None, :, None, None]


def _run_case(key, N, C_in, H, W, C_out, stride):
    kx, kg, kb, *kws = jax.random.split(key, 3 + stride)
    x = jax.random.normal(kx, (N, C_in, H, W), dtype=jnp.float32)

    if stride == 2:
        c_outs = [C_out // 2, C_out - C_out // 2]
    else:
        assert C_out % 4 == 0
        c_outs = [C_out // 4] * 4
    conv_weights = [
        jax.random.normal(kw, (cb, C_in, 1, 1), dtype=jnp.float32) * 0.1
        for kw, cb in zip(kws, c_outs)
    ]

    bn_gamma = 1.0 + 0.1 * jax.random.normal(kg, (C_out,), dtype=jnp.float32)
    bn_beta = 0.1 * jax.random.normal(kb, (C_out,), dtype=jnp.float32)
    bn_mean = jnp.zeros((C_out,), dtype=jnp.float32)
    bn_var = jnp.ones((C_out,), dtype=jnp.float32)

    out = factorized_reduce(x, conv_weights, bn_gamma, bn_beta, bn_mean, bn_var,
                            stride=stride)
    out = jax.block_until_ready(out)

    ref = _reference(x, conv_weights, bn_gamma, bn_beta, bn_mean, bn_var, stride)
    # bf16 activations/weights/output in the kernel -> relaxed tolerance vs f32
    out32 = np.asarray(jnp.asarray(out, dtype=jnp.float32))
    np.testing.assert_allclose(out32, np.asarray(ref), rtol=2e-2, atol=2e-2)

    Ho = (H - 1) // stride + 1
    Wo = (W - 1) // stride + 1
    assert out.shape == (N, C_out, Ho, Wo)


if __name__ == "__main__":
    key = jax.random.PRNGKey(0)
    k2, k4 = jax.random.split(key)
    # stride=2 FactorizedReduce (small shapes consistent with the module)
    _run_case(k2, N=2, C_in=4, H=16, W=16, C_out=4, stride=2)
    # stride=4 FactorizedReduce (C_out % 4 == 0)
    _run_case(k4, N=2, C_in=4, H=16, W=16, C_out=8, stride=4)
    print("KERNEL_OK")
</pallas_src>

<mosaic_0001>
module attributes {stable_mosaic.version = 11 : i64} {
  func.func @_fr_kernel(%arg0: i32, %arg1: i32, %arg2: memref<1x8x64xbf16, #tpu.memory_space<vmem>>, %arg3: memref<4x8xbf16, #tpu.memory_space<vmem>>, %arg4: memref<4x1xf32, #tpu.memory_space<vmem>>, %arg5: memref<1x4x64xbf16, #tpu.memory_space<vmem>>) attributes {dimension_semantics = [#tpu.dimension_semantics<parallel>, #tpu.dimension_semantics<parallel>], iteration_bounds = array<i64: 2, 1>, scalar_prefetch = 0 : i64, scratch_operands = 0 : i64, tpu.core_type = #tpu.core_type<tc>, window_params = [{transform_indices = @transform_0, window_bounds = array<i64: 1, 8, 64>}, {pipeline_mode = #tpu.pipeline_mode<synchronous>, transform_indices = @transform_1, window_bounds = array<i64: 4, 8>}, {pipeline_mode = #tpu.pipeline_mode<synchronous>, transform_indices = @transform_2, window_bounds = array<i64: 4, 1>}, {transform_indices = @transform_3, window_bounds = array<i64: 1, 4, 64>}]} {
    %c0 = arith.constant 0 : index
    %c0_0 = arith.constant 0 : index
    %0 = vector.load %arg3[%c0, %c0_0] : memref<4x8xbf16, #tpu.memory_space<vmem>>, vector<4x8xbf16>
    %c0_1 = arith.constant 0 : index
    %c0_2 = arith.constant 0 : index
    %c0_3 = arith.constant 0 : index
    %1 = vector.load %arg2[%c0_1, %c0_2, %c0_3] : memref<1x8x64xbf16, #tpu.memory_space<vmem>>, vector<1x8x64xbf16>
    %2 = vector.shape_cast %1 : vector<1x8x64xbf16> to vector<8x64xbf16>
    %cst = arith.constant dense<0.000000e+00> : vector<4x64xf32>
    %3 = tpu.matmul %0, %2, %cst {dimension_numbers = #tpu.dot_dimension_numbers<[1], [0], [0], [1], [0, 0, 1, 1], [], []>} : vector<4x8xbf16>, vector<8x64xbf16>, vector<4x64xf32> -> vector<4x64xf32>
    %c0_4 = arith.constant 0 : index
    %c0_5 = arith.constant 0 : index
    %4 = vector.load %arg4[%c0_4, %c0_5] : memref<4x1xf32, #tpu.memory_space<vmem>>, vector<4x1xf32>
    %5 = vector.broadcast %4 : vector<4x1xf32> to vector<4x64xf32>
    %6 = arith.addf %3, %5 : vector<4x64xf32>
    %7 = arith.truncf %6 : vector<4x64xf32> to vector<4x64xbf16>
    %c0_6 = arith.constant 0 : index
    %c0_7 = arith.constant 0 : index
    %c0_8 = arith.constant 0 : index
    %8 = vector.load %arg5[%c0_6, %c0_7, %c0_8] : memref<1x4x64xbf16, #tpu.memory_space<vmem>>, vector<1x4x64xbf16>
    %9 = vector.shape_cast %8 : vector<1x4x64xbf16> to vector<4x64xbf16>
    %10 = vector.shape_cast %7 : vector<4x64xbf16> to vector<1x4x64xbf16>
    tpu.vector_store %arg5[%c0_6, %c0_7, %c0_8], %10 {strides = array<i32>} : memref<1x4x64xbf16, #tpu.memory_space<vmem>>, vector<1x4x64xbf16>,
    return
  }
  func.func @transform_0(%arg0: i32, %arg1: i32) -> (i32, i32, i32) {
    %c0_i32 = arith.constant 0 : i32
    %c0_i32_0 = arith.constant 0 : i32
    return %arg0, %c0_i32, %arg1 : i32, i32, i32
  }
  func.func @transform_1(%arg0: i32, %arg1: i32) -> (i32, i32) {
    %c0_i32 = arith.constant 0 : i32
    %c0_i32_0 = arith.constant 0 : i32
    %c0_i32_1 = arith.constant 0 : i32
    return %c0_i32, %c0_i32_0 : i32, i32
  }
  func.func @transform_2(%arg0: i32, %arg1: i32) -> (i32, i32) {
    %c0_i32 = arith.constant 0 : i32
    %c0_i32_0 = arith.constant 0 : i32
    %c0_i32_1 = arith.constant 0 : i32
    return %c0_i32, %c0_i32_0 : i32, i32
  }
  func.func @transform_3(%arg0: i32, %arg1: i32) -> (i32, i32, i32) {
    %c0_i32 = arith.constant 0 : i32
    %c0_i32_0 = arith.constant 0 : i32
    return %arg0, %c0_i32, %arg1 : i32, i32, i32
  }
}

</mosaic_0001>

<bundles_post_ra>
// kernel: factorized_reduce.1
= control target key start
LH: loop header
LB: loop body
LE: loop exit
PB: predicated region body
PF: predicated region fallthrough
CT: control target
= control target key end

     0   :  { %s385_s12 = smov 0   ;;  %s387_s13 = smov 0   ;;  %s424_s0 = inlined_call_operand.vmem [shape: bf16[2,8,64], index: 0, kind: input, shape index: {}]   ;;  %s425_s1 = inlined_call_operand.vmem [shape: bf16[4,8], index: 1, kind: input, shape index: {}]   ;;  %s426_s2 = inlined_call_operand.vmem [shape: f32[4,1], index: 2, kind: input, shape index: {}]   ;;  %s427_s3 = inlined_call_operand.vmem [shape: bf16[2,4,64], index: 3, kind: output, shape index: {}]  }
   0x1   :  { %s389_s14 = smov 0  }
   0x2 LB: > { %s25_s15 = sadd.s32 1, %s358_s13  ;;  %p308_p0 = scmp.ge.s32.totalorder %s362_s14, 1  ;;  %s362_s14 = sphi %s389_s14, %s13_s14   ;;  %s358_s13 = sphi %s387_s13, %s429_s13   ;;  %s354_s12 = sphi %s385_s12, %s428_s12  }
   0x3   : > { %p27_p1 = scmp.ge.s32.totalorder %s25_s15, 2  ;;  %p155_p2 = scmp.lt.s32.totalorder %s362_s14, 3 }
   0x5   : > { %s431_s15 = smov (%p27_p1, %s25_s15), 0  ;;  %p156_p3 = pnand %p308_p0, %p155_p2 }
   0x6   : > { %p183_p4 = scmp.lt.s32.totalorder (!%p156_p3), %s354_s12, 1 }
   0x7   : > { %159 = sbr.rel (%p156_p3) target bundleno = 154 (0x9a), region = 32 }
   0xc   : > { %v364_v0 = vmov 0   ;;  %v200_v1 = vld [vmem:[%s426_s2] sm:$0xf]  ;;  %s433_s12 = smov (!%p183_p4, %s354_s12), 1  ;;  %vm210_vm0 = vcmask 1043456   ;;  %vm206_vm1 = vcmask 64512  }
   0xd   : > { %339 = vset.pattern.permute.xlu0 %v364_v0  ;;  %s309_s18 = sshll.u32 %s433_s12, 2  ;;  %v198_v4 = vld [vmem:[%s425_s1] sm:$0x3]  ;;  %s310_s24 = sshll.u32 %s433_s12, 1  ;;  %vm228_vm2 = vcmask 517120  }
   0xe   : > { %203 = vperm.xlu0 %339, %v200_v1   ;;  %s189_s21 = scalar_lea.vmem %s424_s0, %s309_s18  ;;  %s196_s27 = scalar_lea.vmem %s427_s3, %s310_s24 }
   0xf   : > { %v199_v2 = vld [vmem:[%s189_s21] sm:$0xf] }
  0x10   : > { %v212_v3 = vsel %vm210_vm0, %v199_v2, 0 }
  0x11   : > { %221 = vmatpush.bf16.msra.mxu0 %v212_v3 }
  0x14   : > { %311 = vmatmul.msk.bf16.vlgmr.msra.gmra.mxu0 %vm206_vm1, %v198_v4 }
  0x80   : > { %v204_v5 = vpop.permute.xlu0 %203 }
  0x91   : > { %v223_v6 = vpop.f32.mrf.mxu0 }
  0x92   : > { %v224_v7 = vadd.f32 %v223_v6, %v204_v5 }
  0x94   : > { %v227_v8 = vpack.c.bf16 %v224_v7, %v224_v7 }
  0x96   : > { %229 = vst.msk [vmem:[%s196_s27] sm:$0x3] %vm228_vm2, %v227_v8 }
  0x99   : > { %v225_v9 = vpop.f32.mrf.mxu0 }
  0x9a PF: > { %s13_s14 = sadd.s32 1, %s362_s14   ;;  %s428_s12 = smov %s358_s13 }
  0x9b   : > { %p10_p5 = scmp.ge.s32.totalorder %s13_s14, 4   ;;  %s429_s13 = smov %s431_s15 }
  0x9d   :  { %12 = sbr.rel (!%p10_p5) target bundleno = 2 (0x2), region = 62 }

</bundles_post_ra>
